<compile_context>
chip_gen: v7x
topology: tpu7x:2x2x1
jax: 0.10.0
libtpu: 0.0.40
codegen_flags: <defaults>
</compile_context>

<pallas_src>
import functools

import jax
import jax.numpy as jnp
from jax.experimental import pallas as pl
from jax.experimental.pallas import tpu as pltpu

# nn.LeakyReLU(True): negative_slope = True == 1.0 (module quirk, reproduced).
NEG_SLOPE = 1.0


def _round_up(x, m):
    return (x + m - 1) // m * m


def _choose_row_tile(m):
    """Row tile along the flattened M = B*L axis."""
    if m >= 1024:
        return 512                              # ~85% of HBM roofline per sweep
    if m >= 64:
        return _round_up((m + 1) // 2, 16)      # >=2 grid steps -> both v7x TCs busy
    return _round_up(max(m, 1), 16)             # single tile, bf16 sublane packed


# ----------------------------- kernel bodies ------------------------------ #
# Fused path (identity activation): out = (mask*x) @ W_fused + b_fused.

def _fused_kernel(x_ref, w_ref, b_ref, o_ref):
    y = jnp.dot(x_ref[...].astype(jnp.bfloat16), w_ref[...],
                preferred_element_type=jnp.float32)
    o_ref[...] = (y + b_ref[...]).astype(o_ref.dtype)


def _fused_kernel_masked(mask_ref, x_ref, w_ref, b_ref, o_ref):
    x = x_ref[...] * mask_ref[...]              # (tl,D) * (tl,1) token_drop
    y = jnp.dot(x.astype(jnp.bfloat16), w_ref[...],
                preferred_element_type=jnp.float32)
    o_ref[...] = (y + b_ref[...]).astype(o_ref.dtype)


# Unfused fallback (only used if NEG_SLOPE != 1.0).

def _mlp_kernel(x_ref, w1_ref, b1_ref, w2_ref, b2_ref, o_ref):
    h = jnp.dot(x_ref[...].astype(jnp.bfloat16), w1_ref[...],
                preferred_element_type=jnp.float32) + b1_ref[...]
    h = jnp.where(h >= 0, h, NEG_SLOPE * h)
    y = jnp.dot(h.astype(jnp.bfloat16), w2_ref[...],
                preferred_element_type=jnp.float32) + b2_ref[...]
    o_ref[...] = y.astype(o_ref.dtype)


def _mlp_kernel_masked(mask_ref, x_ref, w1_ref, b1_ref, w2_ref, b2_ref, o_ref):
    x = x_ref[...] * mask_ref[...]
    h = jnp.dot(x.astype(jnp.bfloat16), w1_ref[...],
                preferred_element_type=jnp.float32) + b1_ref[...]
    h = jnp.where(h >= 0, h, NEG_SLOPE * h)
    y = jnp.dot(h.astype(jnp.bfloat16), w2_ref[...],
                preferred_element_type=jnp.float32) + b2_ref[...]
    o_ref[...] = y.astype(o_ref.dtype)


# ----------------------------- pallas wrapper ----------------------------- #

@functools.partial(jax.jit, static_argnames=("tl", "use_mask", "fused", "out_dtype"))
def _embed_pallas(x, mask, weights, *, tl, use_mask, fused, out_dtype):
    """x: (Mp, D) f32, Mp % tl == 0.  mask: (Mp, 1) f32 or None.
    weights (fused):   (w_fused (D,H) bf16, b_fused (1,H) f32)
    weights (unfused): (w1_t (D,H) bf16, b1 (1,H) f32, w2_t (H,H) bf16, b2 (1,H) f32)."""
    mp, d = x.shape
    h = weights[-1].shape[-1]
    nm = mp // tl

    if fused:
        kernel = _fused_kernel_masked if use_mask else _fused_kernel
        w_specs = [pl.BlockSpec((d, h), lambda i: (0, 0)),
                   pl.BlockSpec((1, h), lambda i: (0, 0))]
        flops = 2 * mp * d * h
    else:
        kernel = _mlp_kernel_masked if use_mask else _mlp_kernel
        w_specs = [pl.BlockSpec((d, h), lambda i: (0, 0)),
                   pl.BlockSpec((1, h), lambda i: (0, 0)),
                   pl.BlockSpec((h, h), lambda i: (0, 0)),
                   pl.BlockSpec((1, h), lambda i: (0, 0))]
        flops = 2 * mp * (d + h) * h

    in_specs = [pl.BlockSpec((tl, d), lambda i: (i, 0))] + w_specs
    args = [x, *weights]
    if use_mask:
        in_specs = [pl.BlockSpec((tl, 1), lambda i: (i, 0))] + in_specs
        args = [mask] + args

    bytes_accessed = (sum(a.size * a.dtype.itemsize for a in args)
                      + mp * h * jnp.dtype(out_dtype).itemsize)

    return pl.pallas_call(
        kernel,
        out_shape=jax.ShapeDtypeStruct((mp, h), out_dtype),
        grid_spec=pltpu.PrefetchScalarGridSpec(
            num_scalar_prefetch=0,
            grid=(nm,),
            in_specs=in_specs,
            out_specs=pl.BlockSpec((tl, h), lambda i: (i, 0)),
        ),
        compiler_params=pltpu.CompilerParams(
            dimension_semantics=("parallel",)),
        cost_estimate=pl.CostEstimate(
            flops=flops, transcendentals=0, bytes_accessed=bytes_accessed),
    )(*args)


# ------------------------------- module API -------------------------------- #

def init_condition_embedder_params(key, cond_size, cond_hidden_size=256):
    """nn.Linear-style init (uniform +/- 1/sqrt(fan_in)), PyTorch (out, in) layout."""
    k1, k2, k3, k4 = jax.random.split(key, 4)
    b_in1 = 1.0 / jnp.sqrt(jnp.float32(cond_size))
    b_in2 = 1.0 / jnp.sqrt(jnp.float32(cond_hidden_size))
    w1 = jax.random.uniform(k1, (cond_hidden_size, cond_size), jnp.float32, -b_in1, b_in1)
    b1 = jax.random.uniform(k2, (cond_hidden_size,), jnp.float32, -b_in1, b_in1)
    w2 = jax.random.uniform(k3, (cond_hidden_size, cond_hidden_size), jnp.float32, -b_in2, b_in2)
    b2 = jax.random.uniform(k4, (cond_hidden_size,), jnp.float32, -b_in2, b_in2)
    return {"w1": w1, "b1": b1, "w2": w2, "b2": b2}


def prepare_condition_embedder_params(params):
    """One-time weight prep, hoisted out of the per-call path.

    With the identity activation (NEG_SLOPE == 1.0) the two Linears fuse:
      y = x @ (W1^T W2^T) + (b1 W2^T + b2)
    Fusion is done in f32 (HIGHEST precision), then the weight is cast bf16."""
    hp = jax.lax.Precision.HIGHEST
    if NEG_SLOPE == 1.0:
        w_fused = jnp.matmul(params["w1"].T, params["w2"].T, precision=hp)      # (D, H)
        b_fused = jnp.matmul(params["b1"], params["w2"].T, precision=hp) + params["b2"]
        return {"fused": True,
                "w": w_fused.astype(jnp.bfloat16),
                "b": b_fused.reshape(1, -1).astype(jnp.float32)}
    return {"fused": False,
            "w1": params["w1"].T.astype(jnp.bfloat16),                          # (D, H)
            "b1": params["b1"].reshape(1, -1).astype(jnp.float32),
            "w2": params["w2"].T.astype(jnp.bfloat16),                          # (H, H)
            "b2": params["b2"].reshape(1, -1).astype(jnp.float32)}


def condition_embedder_forward(cond, prepared, *, train, dropout_prob,
                               force_drop_ids=None, drop_rng=None,
                               out_dtype=jnp.float32):
    """cond: (B, L, D) f32 -> (B, L, H).  Matches the PyTorch forward()."""
    B, L, D = cond.shape
    M = B * L

    # token_drop: per-batch keep flags -> per-row mask (only when needed).
    use_dropout = dropout_prob > 0
    use_mask = (train and use_dropout) or (force_drop_ids is not None)
    if use_mask:
        if force_drop_ids is None:
            if drop_rng is None:
                raise ValueError("drop_rng is required when train=True and dropout_prob > 0")
            drop_ids = jax.random.uniform(drop_rng, (B,)) < dropout_prob
        else:
            drop_ids = force_drop_ids == 1
        keep = jnp.where(drop_ids, 0.0, 1.0).astype(jnp.float32)        # (B,)
        mask = jnp.broadcast_to(keep[:, None], (B, L)).reshape(M, 1)    # (M, 1)
    else:
        mask = None

    # Flatten (B, L) -> M rows; pad M up to a multiple of the row tile.
    x = cond.reshape(M, D)
    tl = _choose_row_tile(M)
    Mp = _round_up(M, tl)
    if Mp != M:
        x = jnp.pad(x, ((0, Mp - M), (0, 0)))
        if mask is not None:
            mask = jnp.pad(mask, ((0, Mp - M), (0, 0)))

    if prepared["fused"]:
        weights = (prepared["w"], prepared["b"])
    else:
        weights = (prepared["w1"], prepared["b1"], prepared["w2"], prepared["b2"])

    out = _embed_pallas(x, mask, weights, tl=tl, use_mask=use_mask,
                        fused=prepared["fused"], out_dtype=out_dtype)
    H = out.shape[-1]
    return out[:M].reshape(B, L, H)


# ------------------------------- references -------------------------------- #

def _reference_fused_bf16(cond, prepared, keep):
    """Same fused / bf16-operand / f32-accumulate recipe as the kernel."""
    x = cond * keep.astype(cond.dtype)[:, None, None]
    y = jnp.einsum("bld,dh->blh", x.astype(jnp.bfloat16), prepared["w"],
                   preferred_element_type=jnp.float32) + prepared["b"][0]
    return y


def _reference_f32(cond, params, keep):
    """True f32, unfused math of the PyTorch module (bounds the bf16 drift)."""
    hp = jax.lax.Precision.HIGHEST
    x = cond * keep.astype(cond.dtype)[:, None, None]
    h = jnp.einsum("bld,hd->blh", x, params["w1"], precision=hp,
                   preferred_element_type=jnp.float32) + params["b1"]
    h = jnp.where(h >= 0, h, NEG_SLOPE * h)
    y = jnp.einsum("blh,gh->blg", h, params["w2"], precision=hp,
                   preferred_element_type=jnp.float32) + params["b2"]
    return y


if __name__ == "__main__":
    # Small shapes consistent with the module: cond_seq_len=8, cond_size=32, H=256.
    B, L, D, H = 2, 8, 32, 256
    dropout_prob = 0.1

    key = jax.random.PRNGKey(0)
    k_params, k_cond = jax.random.split(key)
    params = init_condition_embedder_params(k_params, cond_size=D, cond_hidden_size=H)
    prepared = prepare_condition_embedder_params(params)
    cond = jax.random.normal(k_cond, (B, L, D), jnp.float32)

    # Eval-mode forward (train=False -> no token drop), the standard inference path.
    out = condition_embedder_forward(cond, prepared, train=False,
                                     dropout_prob=dropout_prob)
    out = jax.block_until_ready(out)
    assert out.shape == (B, L, H) and out.dtype == jnp.float32

    # force_drop_ids path (classifier-free-guidance unconditional branch).
    force_drop = jnp.array([1, 0], dtype=jnp.int32)
    out_cfg = condition_embedder_forward(cond, prepared, train=False,
                                         dropout_prob=dropout_prob,
                                         force_drop_ids=force_drop)
    out_cfg = jax.block_until_ready(out_cfg)

    keep_all = jnp.ones((B,), jnp.float32)
    keep_cfg = jnp.where(force_drop == 1, 0.0, 1.0)

    # Tight check vs. a reference using the exact same fused-bf16 recipe.
    ref = _reference_fused_bf16(cond, prepared, keep_all)
    ref_cfg = _reference_fused_bf16(cond, prepared, keep_cfg)
    assert jnp.allclose(out, ref, atol=1e-4, rtol=1e-4)
    assert jnp.allclose(out_cfg, ref_cfg, atol=1e-4, rtol=1e-4)

    # Loose check vs. the true-f32 PyTorch math (bounds the bf16-operand drift).
    ref32 = _reference_f32(cond, params, keep_all)
    ref32_cfg = _reference_f32(cond, params, keep_cfg)
    assert jnp.allclose(out, ref32, atol=5e-2, rtol=5e-2)
    assert jnp.allclose(out_cfg, ref32_cfg, atol=5e-2, rtol=5e-2)

    print("KERNEL_OK")
</pallas_src>

<mosaic_0001>
module attributes {stable_mosaic.version = 11 : i64} {
  func.func @_fused_kernel(%arg0: i32, %arg1: memref<16x32xf32, #tpu.memory_space<vmem>>, %arg2: memref<32x256xbf16, #tpu.memory_space<vmem>>, %arg3: memref<1x256xf32, #tpu.memory_space<vmem>>, %arg4: memref<16x256xf32, #tpu.memory_space<vmem>>) attributes {dimension_semantics = [#tpu.dimension_semantics<parallel>], iteration_bounds = array<i64: 1>, scalar_prefetch = 0 : i64, scratch_operands = 0 : i64, tpu.core_type = #tpu.core_type<tc>, window_params = [{transform_indices = @transform_0, window_bounds = array<i64: 16, 32>}, {pipeline_mode = #tpu.pipeline_mode<synchronous>, transform_indices = @transform_1, window_bounds = array<i64: 32, 256>}, {pipeline_mode = #tpu.pipeline_mode<synchronous>, transform_indices = @transform_2, window_bounds = array<i64: 1, 256>}, {transform_indices = @transform_3, window_bounds = array<i64: 16, 256>}]} {
    %c0 = arith.constant 0 : index
    %c0_0 = arith.constant 0 : index
    %0 = vector.load %arg1[%c0, %c0_0] : memref<16x32xf32, #tpu.memory_space<vmem>>, vector<16x32xf32>
    %1 = arith.truncf %0 : vector<16x32xf32> to vector<16x32xbf16>
    %c0_1 = arith.constant 0 : index
    %c0_2 = arith.constant 0 : index
    %2 = vector.load %arg2[%c0_1, %c0_2] : memref<32x256xbf16, #tpu.memory_space<vmem>>, vector<32x256xbf16>
    %cst = arith.constant dense<0.000000e+00> : vector<16x256xf32>
    %3 = tpu.matmul %1, %2, %cst {dimension_numbers = #tpu.dot_dimension_numbers<[1], [0], [0], [1], [0, 0, 1, 1], [], []>} : vector<16x32xbf16>, vector<32x256xbf16>, vector<16x256xf32> -> vector<16x256xf32>
    %c0_3 = arith.constant 0 : index
    %c0_4 = arith.constant 0 : index
    %4 = vector.load %arg3[%c0_3, %c0_4] : memref<1x256xf32, #tpu.memory_space<vmem>>, vector<1x256xf32>
    %5 = vector.broadcast %4 : vector<1x256xf32> to vector<16x256xf32>
    %6 = arith.addf %3, %5 : vector<16x256xf32>
    %c0_5 = arith.constant 0 : index
    %c0_6 = arith.constant 0 : index
    %7 = vector.load %arg4[%c0_5, %c0_6] : memref<16x256xf32, #tpu.memory_space<vmem>>, vector<16x256xf32>
    tpu.vector_store %arg4[%c0_5, %c0_6], %6 {strides = array<i32>} : memref<16x256xf32, #tpu.memory_space<vmem>>, vector<16x256xf32>,
    return
  }
  func.func @transform_0(%arg0: i32) -> (i32, i32) {
    %c0_i32 = arith.constant 0 : i32
    %c0_i32_0 = arith.constant 0 : i32
    return %arg0, %c0_i32 : i32, i32
  }
  func.func @transform_1(%arg0: i32) -> (i32, i32) {
    %c0_i32 = arith.constant 0 : i32
    %c0_i32_0 = arith.constant 0 : i32
    %c0_i32_1 = arith.constant 0 : i32
    return %c0_i32, %c0_i32_0 : i32, i32
  }
  func.func @transform_2(%arg0: i32) -> (i32, i32) {
    %c0_i32 = arith.constant 0 : i32
    %c0_i32_0 = arith.constant 0 : i32
    %c0_i32_1 = arith.constant 0 : i32
    return %c0_i32, %c0_i32_0 : i32, i32
  }
  func.func @transform_3(%arg0: i32) -> (i32, i32) {
    %c0_i32 = arith.constant 0 : i32
    %c0_i32_0 = arith.constant 0 : i32
    return %arg0, %c0_i32 : i32, i32
  }
}

</mosaic_0001>

<bundles_post_ra>
// kernel: _embed_pallas.1
= control target key start
LH: loop header
LB: loop body
LE: loop exit
PB: predicated region body
PF: predicated region fallthrough
CT: control target
= control target key end

     0   :  { %8 = vsyncpa [#allocation3], 0  ;;  %s310_s0 = inlined_call_operand.hbm [shape: f32[16,32], index: 0, kind: input, shape index: {}]   ;;  %s311_s1 = inlined_call_operand.hbm [shape: bf16[32,256], index: 1, kind: input, shape index: {}]   ;;  %s312_s2 = inlined_call_operand.vmem [shape: f32[1,256], index: 2, kind: input, shape index: {}]   ;;  %s313_s3 = inlined_call_operand.hbm [shape: f32[16,256], index: 3, kind: output, shape index: {}]  }
   0x1   :  { %9 = vsyncpa [#allocation6], 0 }
   0x2   :  { %10 = vsyncpa [#allocation4], 0  ;;  %s243_s12 = smov [#allocation2]   ;;  %s171_s16 = scalar_lea.hbm %s310_s0, 256 }
   0x3   :  { %s16_s13 = sshll.u32 %s243_s12, 4  ;;  %p172_p0 = scmp.ne.s32.totalorder %s310_s0, %s171_s16  ;;  %s17_s13 = int_to_ptr.vmem [resolvable:$true] %s16_s13 }
   0x4   :  { %p175_p1 = scmp.lt.u32.totalorder %s171_s16, %s310_s0 }
   0x6   :  { %p177_p2 = pnand %p175_p1, %p172_p0 }
   0x8   :  { %180 = shalt.err (!%p177_p2)
}
   0x9   :  { %s181_s21 = scalar_lea.vmem %s17_s13, 256  ;;  %p186_p4 = scmp.lt.s32.totalorder %s17_s13, %s17_s13 }
   0xa   :  { %p182_p3 = scmp.ne.s32.totalorder %s17_s13, %s181_s21  ;;  %p187_p5 = scmp.lt.s32.totalorder %s181_s21, %s181_s21 }
   0xc   :  { %p188_p6 = por %p187_p5, %p186_p4 }
   0xe   :  { %p189_p7 = pnand %p188_p6, %p182_p3 }
  0x10   :  { %192 = shalt.err (!%p189_p7)
}
  0x11   :  { %s244_s22 = smov 128   ;;  %s245_s23 = smov 8  }
  0x12   :  { %22 = dma.hbm_to_vmem [thread:$0]  %s310_s0, 256, %s17_s13, [#allocation3], %s244_s22, %s244_s22, %s245_s23  }
  0x13   :  { %s246_s26 = smov [#allocation5]   ;;  %s193_s30 = scalar_lea.hbm %s311_s1, 512 }
  0x14   :  { %s28_s27 = sshll.u32 %s246_s26, 4  ;;  %p194_p8 = scmp.ne.s32.totalorder %s311_s1, %s193_s30  ;;  %s29_s27 = int_to_ptr.vmem [resolvable:$true] %s28_s27 }
  0x15   :  { %p197_p9 = scmp.lt.u32.totalorder %s193_s30, %s311_s1 }
  0x17   :  { %p199_p10 = pnand %p197_p9, %p194_p8 }
  0x19   :  { %202 = shalt.err (!%p199_p10)
}
  0x1a   :  { %s203_s8 = scalar_lea.vmem %s29_s27, 512  ;;  %p208_p12 = scmp.lt.s32.totalorder %s29_s27, %s29_s27 }
  0x1b   :  { %p204_p11 = scmp.ne.s32.totalorder %s29_s27, %s203_s8  ;;  %p209_p13 = scmp.lt.s32.totalorder %s203_s8, %s203_s8 }
  0x1d   :  { %p210_p0 = por %p209_p13, %p208_p12 }
  0x1f   :  { %p211_p1 = pnand %p210_p0, %p204_p11 }
  0x21   :  { %214 = shalt.err (!%p211_p1)
}
  0x22   :  { %34 = dma.hbm_to_vmem [thread:$0]  %s311_s1, 512, %s29_s27, [#allocation6], %s244_s22, %s244_s22, %s245_s23  }
  0x23   :  { %237 = dma.done.wait [#allocation3], 256  }
  0x24   :  { %238 = vsyncadd [#allocation3], 4294967040 }
  0x25   :  { %239 = dma.done.wait [#allocation6], 512  }
  0x26   :  { %240 = vsyncadd [#allocation6], 4294966784  ;;  %v247_v0 = vmov 0   ;;  %v165_v1 = vld [vmem:[#allocation5 + $0x4] ss:$8 sps:$4 sm:$0xff]   ;;  %v44_v5 = vld [vmem:[#allocation2] sm:$0xff]  ;;  %v53_v8 = vlaneseq }
  0x27   :  { %119 = vmatprep.mubr.bf16.mxu0 %v247_v0  ;;  %v167_v2 = vld [vmem:[#allocation5] ss:$8 sps:$4 sm:$0xff]   ;;  %87 = vmatprep.subr.bf16.mxu0 %v165_v1  ;;  %v168_v3 = vld [vmem:[#allocation5 + $0x14] ss:$8 sps:$4 sm:$0xff]   ;;  %v170_v4 = vld [vmem:[#allocation5 + $0x10] ss:$8 sps:$4 sm:$0xff]  }
  0x28   :  { %88 = vmatpush1.bf16.msra.mxu0 %v167_v2  ;;  %v45_v6 = vld [vmem:[#allocation2 + $0x8] sm:$0xff]  ;;  %vm83_vm0 = vcmask 261120   ;;  %v54_v9 = vshrl.u32 %v53_v8, 7  ;;  %v51_v11 = vld [vmem:[%s312_s2] sm:$0x3]  ;;  %s248_s11 = smov [#allocation7]  }
  0x29   :  { %89 = vmatprep.subr.bf16.mxu0 %v168_v3  ;;  %v46_v7 = vpack.c.bf16 %v45_v6, %v44_v5  ;;  %s139_s12 = sshll.u32 %s248_s11, 4  ;;  %s140_s12 = int_to_ptr.vmem [resolvable:$true] %s139_s12 }
  0x2a   :  { %v55_v10 = vsub.s32 0, %v54_v9  ;;  %v59_v12 = vsub.s32 1, %v54_v9  ;;  %s215_s13 = scalar_lea.vmem %s140_s12, 512  ;;  %p220_p3 = scmp.lt.s32.totalorder %s140_s12, %s140_s12 }
  0x2b   :  { %p216_p2 = scmp.ne.s32.totalorder %s140_s12, %s215_s13  ;;  %p221_p4 = scmp.lt.s32.totalorder %s215_s13, %s215_s13 }
  0x2c   :  { %90 = vmatpush1.bf16.msra.mxu0 %v170_v4  ;;  %v56_v13 = vrot.slane %v51_v11, %v55_v10  ;;  %v60_v14 = vrot.slane %v51_v11, %v59_v12 }
  0x2d   :  { %p222_p5 = por %p221_p4, %p220_p3 }
  0x2f   :  { %156 = vmatmul.mubr.msk.bf16.vlgmr.msra.gmra.mrb[0].mxu0 %vm83_vm0, %v46_v7  ;;  %p223_p6 = pnand %p222_p5, %p216_p2 }
 0x102   :  { %v121_v15 = vpop.f32.mrb[0].mxu0 }
 0x103   :  { %v122_v16 = vadd.f32 %v121_v15, %v56_v13  ;;  %v123_v17 = vpop.f32.mrb[1].mxu0 }
 0x104   :  { %v124_v18 = vadd.f32 %v123_v17, %v60_v14  ;;  %v125_v19 = vpop.f32.mrb[2].mxu0 }
 0x105   :  { %130 = vst [vmem:[#allocation7] sm:$0xff] %v122_v16  ;;  %v126_v20 = vadd.f32 %v125_v19, %v56_v13  ;;  %v127_v21 = vpop.f32.mrb[3].mxu0 }
 0x106   :  { %131 = vst [vmem:[#allocation7 + $0x8] sm:$0xff] %v124_v18  ;;  %v128_v22 = vadd.f32 %v127_v21, %v60_v14 }
 0x107   :  { %132 = vst [vmem:[#allocation7 + $0x10] sm:$0xff] %v126_v20 }
 0x108   :  { %133 = vst [vmem:[#allocation7 + $0x18] sm:$0xff] %v128_v22 }
 0x109   :  { %226 = shalt.err (!%p223_p6)
}
 0x10a   :  { %s227_s15 = scalar_lea.hbm %s313_s3, 512 }
 0x10b   :  { %p228_p7 = scmp.ne.s32.totalorder %s313_s3, %s227_s15  ;;  %p231_p8 = scmp.lt.u32.totalorder %s227_s15, %s313_s3 }
 0x10d   :  { %p233_p9 = pnand %p231_p8, %p228_p7 }
 0x10f   :  { %236 = shalt.err (!%p233_p9)
}
 0x110   :  { %s249_s20 = smov 256   ;;  %s250_s21 = smov 16  }
 0x111   :  { %145 = dma.vmem_to_hbm [thread:$0]  %s140_s12, 512, %s313_s3, [#allocation4], %s249_s20, %s249_s20, %s250_s21  }
 0x112   :  { %241 = dma.done.wait [#allocation4], 512  }
 0x113   :  { %242 = vsyncadd [#allocation4], 4294966784 }
 0x114   :  { %149 = vsyncpa [#allocation3], 1 }
 0x115   :  { %150 = vsyncpa [#allocation6], 1 }
 0x116   :  { %151 = vsyncpa [#allocation4], 1 }

</bundles_post_ra>
